<compile_context>
chip_gen: v5e
topology: v5e:2x2
jax: 0.10.0
libtpu: 0.0.40
codegen_flags: <defaults>
</compile_context>

<pallas_src>
import jax
import jax.numpy as jnp
import numpy as np
from jax.experimental import pallas as pl
from jax.experimental.pallas import tpu as pltpu

LANE = 128
SUBLANE = 8
NEG_BIG = -1e30  # f32 bias for padded action lanes -> exp() underflows to 0


def _round_up(x, m):
    return ((x + m - 1) // m) * m


def _default_num_cores():
    """Best-effort TensorCore count per chip (2 on v7x, else 1)."""
    try:
        kind = jax.devices()[0].device_kind.lower()
    except Exception:
        return 1
    return 2 if ("v7" in kind or "7x" in kind) else 1


def _choose_batch_tile(B, num_cores, max_tile=1024):
    """Largest tile <= max_tile, multiple of 8 sublanes, ~num_cores grid steps."""
    tb = _round_up(pl.cdiv(B, max(1, num_cores)), SUBLANE)
    tb = min(max_tile, tb)
    if tb >= B:
        tb = B  # a block dim equal to the full array dim is always legal
    return int(tb)


# --------------------------------------------------------------------------
# Kernel: fused fc1 -> relu -> fc2 -> relu -> fc3 -> softmax for a batch tile
# --------------------------------------------------------------------------
def actor_forward_kernel(x_ref, w1_ref, b1_ref, w2_ref, b2_ref, w3_ref, b3_ref,
                         out_ref):
    # fc1 + relu  (bf16 MXU inputs, f32 accumulation / element-wise math)
    h1 = jnp.dot(x_ref[...], w1_ref[...],
                 preferred_element_type=jnp.float32) + b1_ref[...]
    h1 = jnp.maximum(h1, 0.0)

    # fc2 + relu
    h2 = jnp.dot(h1.astype(jnp.bfloat16), w2_ref[...],
                 preferred_element_type=jnp.float32) + b2_ref[...]
    h2 = jnp.maximum(h2, 0.0)

    # fc3 (action logits); padded action lanes carry a -1e30 f32 bias
    logits = jnp.dot(h2.astype(jnp.bfloat16), w3_ref[...],
                     preferred_element_type=jnp.float32) + b3_ref[...]

    # numerically-stable softmax over the (lane-dense, padded) action axis
    m = jnp.max(logits, axis=-1, keepdims=True)
    e = jnp.exp(logits - m)
    s = jnp.sum(e, axis=-1, keepdims=True)
    # exact reciprocal so probabilities sum to 1 for downstream sampling
    out_ref[...] = (e * pl.reciprocal(s, approx=False)).astype(out_ref.dtype)


# --------------------------------------------------------------------------
# One-time parameter layout plumbing (hoisted out of the forward path)
# --------------------------------------------------------------------------
def prepare_params(params):
    """Pad hidden/action dims to 128 lanes and cast weights to bf16, ONCE.

    Logical params: weights stored (in, out) (transposed vs. torch nn.Linear),
    biases (1, out).  The input feature dim is left at its real size.
    """
    w1, b1, w2, b2, w3, b3 = params
    din, d1 = w1.shape
    d2, na = w2.shape[1], w3.shape[1]
    d1_p, d2_p, na_p = (_round_up(d, LANE) for d in (d1, d2, na))

    f32, bf16 = jnp.float32, jnp.bfloat16
    w1p = jnp.zeros((din, d1_p), bf16).at[:, :d1].set(w1.astype(bf16))
    w2p = jnp.zeros((d1_p, d2_p), bf16).at[:d1, :d2].set(w2.astype(bf16))
    w3p = jnp.zeros((d2_p, na_p), bf16).at[:d2, :na].set(w3.astype(bf16))
    b1p = jnp.zeros((1, d1_p), f32).at[:, :d1].set(b1)
    b2p = jnp.zeros((1, d2_p), f32).at[:, :d2].set(b2)
    b3p = jnp.full((1, na_p), NEG_BIG, f32).at[:, :na].set(b3)
    return (w1p, b1p, w2p, b2p, w3p, b3p)


# --------------------------------------------------------------------------
# Forward wrapper
# --------------------------------------------------------------------------
def actor_forward(state, padded_params, *, batch_tile=None, num_cores=None):
    """Returns softmax probabilities as a bf16 (B, 128)-padded block.

    Real action probabilities live in columns [:n_actions]; padded lanes are
    exactly 0, so downstream consumers may read the padded block directly.
    """
    w1p, b1p, w2p, b2p, w3p, b3p = padded_params
    B, din = state.shape
    d1_p, d2_p, na_p = w1p.shape[1], w2p.shape[1], w3p.shape[1]

    if num_cores is None:
        num_cores = _default_num_cores()
    tb = batch_tile if batch_tile is not None else _choose_batch_tile(B, num_cores)

    xb = state.astype(jnp.bfloat16)        # cast only; no padded copy of state
    resident = lambda i: (0, 0)            # weights/biases: same block each step

    out = pl.pallas_call(
        actor_forward_kernel,
        out_shape=jax.ShapeDtypeStruct((B, na_p), jnp.bfloat16),
        grid=(pl.cdiv(B, tb),),
        in_specs=[
            pl.BlockSpec((tb, din), lambda i: (i, 0)),    # x: pipelined, real width
            pl.BlockSpec((din, d1_p), resident),           # w1 (VMEM-resident)
            pl.BlockSpec((1, d1_p), resident),             # b1
            pl.BlockSpec((d1_p, d2_p), resident),          # w2
            pl.BlockSpec((1, d2_p), resident),             # b2
            pl.BlockSpec((d2_p, na_p), resident),          # w3
            pl.BlockSpec((1, na_p), resident),             # b3
        ],
        out_specs=pl.BlockSpec((tb, na_p), lambda i: (i, 0)),
        compiler_params=pltpu.CompilerParams(
            dimension_semantics=("parallel",)),            # megacore on v7x
    )(xb, w1p, b1p, w2p, b2p, w3p, b3p)

    return out


# --------------------------------------------------------------------------
# Init + pure-JAX reference
# --------------------------------------------------------------------------
def init_params(key, input_dims, fc1_dims, fc2_dims, n_actions):
    """Deterministic init mimicking torch.nn.Linear default (uniform +-1/sqrt(fan_in)).
    Weights stored as (in, out)."""
    def linear_init(k, fan_in, fan_out):
        kw, kb = jax.random.split(k)
        bound = 1.0 / np.sqrt(fan_in)
        w = jax.random.uniform(kw, (fan_in, fan_out), jnp.float32, -bound, bound)
        b = jax.random.uniform(kb, (1, fan_out), jnp.float32, -bound, bound)
        return w, b

    k1, k2, k3 = jax.random.split(key, 3)
    w1, b1 = linear_init(k1, input_dims, fc1_dims)
    w2, b2 = linear_init(k2, fc1_dims, fc2_dims)
    w3, b3 = linear_init(k3, fc2_dims, n_actions)
    return (w1, b1, w2, b2, w3, b3)


def actor_forward_ref(state, params):
    """Pure-JAX f32 reference for correctness check."""
    w1, b1, w2, b2, w3, b3 = params
    h1 = jax.nn.relu(state @ w1 + b1)
    h2 = jax.nn.relu(h1 @ w2 + b2)
    logits = h2 @ w3 + b3
    return jax.nn.softmax(logits, axis=1)


if __name__ == "__main__":
    # Small shapes consistent with the module's forward:
    #   state: (batch, input_dims) -> probs: (batch, n_actions)
    batch, input_dims, fc1_dims, fc2_dims, n_actions = 2, 16, 32, 32, 4

    key = jax.random.PRNGKey(0)
    k_params, k_state = jax.random.split(key)
    params = init_params(k_params, input_dims, fc1_dims, fc2_dims, n_actions)
    state = jax.random.normal(k_state, (batch, input_dims), jnp.float32)

    # One-time layout plumbing (cached, reused across every forward call).
    padded_params = prepare_params(params)
    padded_params = jax.tree_util.tree_map(jax.block_until_ready, padded_params)

    # Single fused dispatch: bf16 cast + Pallas kernel under one jit.
    fwd = jax.jit(lambda s, p: actor_forward(s, p))
    out_padded = jax.block_until_ready(fwd(state, padded_params))

    # Demo-only: slice the real action columns for the correctness check
    # (a real consumer would read the padded bf16 block directly).
    probs = np.asarray(out_padded[:, :n_actions].astype(jnp.float32))

    ref = np.asarray(actor_forward_ref(state, params))
    # Tolerances relaxed vs. pure-f32: bf16 MXU inputs + bf16 output store.
    np.testing.assert_allclose(probs, ref, atol=2e-2, rtol=2e-2)
    # rows of a softmax must sum to ~1 (bf16 quantization -> small slack)
    np.testing.assert_allclose(probs.sum(axis=1), np.ones(batch), atol=1e-2)

    print("KERNEL_OK")
</pallas_src>

<mosaic_0001>
module attributes {stable_mosaic.version = 11 : i64} {
  func.func @actor_forward_kernel(%arg0: i32, %arg1: memref<2x16xbf16, #tpu.memory_space<vmem>>, %arg2: memref<16x128xbf16, #tpu.memory_space<vmem>>, %arg3: memref<1x128xf32, #tpu.memory_space<vmem>>, %arg4: memref<128x128xbf16, #tpu.memory_space<vmem>>, %arg5: memref<1x128xf32, #tpu.memory_space<vmem>>, %arg6: memref<128x128xbf16, #tpu.memory_space<vmem>>, %arg7: memref<1x128xf32, #tpu.memory_space<vmem>>, %arg8: memref<2x128xbf16, #tpu.memory_space<vmem>>) attributes {dimension_semantics = [#tpu.dimension_semantics<parallel>], iteration_bounds = array<i64: 1>, scalar_prefetch = 0 : i64, scratch_operands = 0 : i64, tpu.core_type = #tpu.core_type<tc>, window_params = [{transform_indices = @transform_0, window_bounds = array<i64: 2, 16>}, {pipeline_mode = #tpu.pipeline_mode<synchronous>, transform_indices = @transform_1, window_bounds = array<i64: 16, 128>}, {pipeline_mode = #tpu.pipeline_mode<synchronous>, transform_indices = @transform_2, window_bounds = array<i64: 1, 128>}, {pipeline_mode = #tpu.pipeline_mode<synchronous>, transform_indices = @transform_3, window_bounds = array<i64: 128, 128>}, {pipeline_mode = #tpu.pipeline_mode<synchronous>, transform_indices = @transform_4, window_bounds = array<i64: 1, 128>}, {pipeline_mode = #tpu.pipeline_mode<synchronous>, transform_indices = @transform_5, window_bounds = array<i64: 128, 128>}, {pipeline_mode = #tpu.pipeline_mode<synchronous>, transform_indices = @transform_6, window_bounds = array<i64: 1, 128>}, {transform_indices = @transform_7, window_bounds = array<i64: 2, 128>}]} {
    %c0 = arith.constant 0 : index
    %c0_0 = arith.constant 0 : index
    %0 = vector.load %arg1[%c0, %c0_0] : memref<2x16xbf16, #tpu.memory_space<vmem>>, vector<2x16xbf16>
    %c0_1 = arith.constant 0 : index
    %c0_2 = arith.constant 0 : index
    %1 = vector.load %arg2[%c0_1, %c0_2] : memref<16x128xbf16, #tpu.memory_space<vmem>>, vector<16x128xbf16>
    %cst = arith.constant dense<0.000000e+00> : vector<2x128xf32>
    %2 = tpu.matmul %0, %1, %cst {dimension_numbers = #tpu.dot_dimension_numbers<[1], [0], [0], [1], [0, 0, 1, 1], [], []>} : vector<2x16xbf16>, vector<16x128xbf16>, vector<2x128xf32> -> vector<2x128xf32>
    %c0_3 = arith.constant 0 : index
    %c0_4 = arith.constant 0 : index
    %3 = vector.load %arg3[%c0_3, %c0_4] : memref<1x128xf32, #tpu.memory_space<vmem>>, vector<1x128xf32>
    %4 = vector.broadcast %3 : vector<1x128xf32> to vector<2x128xf32>
    %5 = arith.addf %2, %4 : vector<2x128xf32>
    %cst_5 = arith.constant 0.000000e+00 : f32
    %6 = vector.broadcast %cst_5 : f32 to vector<2x128xf32>
    %7 = arith.maximumf %5, %6 : vector<2x128xf32>
    %8 = arith.truncf %7 : vector<2x128xf32> to vector<2x128xbf16>
    %c0_6 = arith.constant 0 : index
    %c0_7 = arith.constant 0 : index
    %9 = vector.load %arg4[%c0_6, %c0_7] : memref<128x128xbf16, #tpu.memory_space<vmem>>, vector<128x128xbf16>
    %cst_8 = arith.constant dense<0.000000e+00> : vector<2x128xf32>
    %10 = tpu.matmul %8, %9, %cst_8 {dimension_numbers = #tpu.dot_dimension_numbers<[1], [0], [0], [1], [0, 0, 1, 1], [], []>} : vector<2x128xbf16>, vector<128x128xbf16>, vector<2x128xf32> -> vector<2x128xf32>
    %c0_9 = arith.constant 0 : index
    %c0_10 = arith.constant 0 : index
    %11 = vector.load %arg5[%c0_9, %c0_10] : memref<1x128xf32, #tpu.memory_space<vmem>>, vector<1x128xf32>
    %12 = vector.broadcast %11 : vector<1x128xf32> to vector<2x128xf32>
    %13 = arith.addf %10, %12 : vector<2x128xf32>
    %cst_11 = arith.constant 0.000000e+00 : f32
    %14 = vector.broadcast %cst_11 : f32 to vector<2x128xf32>
    %15 = arith.maximumf %13, %14 : vector<2x128xf32>
    %16 = arith.truncf %15 : vector<2x128xf32> to vector<2x128xbf16>
    %c0_12 = arith.constant 0 : index
    %c0_13 = arith.constant 0 : index
    %17 = vector.load %arg6[%c0_12, %c0_13] : memref<128x128xbf16, #tpu.memory_space<vmem>>, vector<128x128xbf16>
    %cst_14 = arith.constant dense<0.000000e+00> : vector<2x128xf32>
    %18 = tpu.matmul %16, %17, %cst_14 {dimension_numbers = #tpu.dot_dimension_numbers<[1], [0], [0], [1], [0, 0, 1, 1], [], []>} : vector<2x128xbf16>, vector<128x128xbf16>, vector<2x128xf32> -> vector<2x128xf32>
    %c0_15 = arith.constant 0 : index
    %c0_16 = arith.constant 0 : index
    %19 = vector.load %arg7[%c0_15, %c0_16] : memref<1x128xf32, #tpu.memory_space<vmem>>, vector<1x128xf32>
    %20 = vector.broadcast %19 : vector<1x128xf32> to vector<2x128xf32>
    %21 = arith.addf %18, %20 : vector<2x128xf32>
    %cst_17 = arith.constant dense<0xFF800000> : vector<2xf32>
    %22 = vector.multi_reduction <maximumf>, %21, %cst_17 [1] : vector<2x128xf32> to vector<2xf32>
    %23 = vector.shape_cast %22 : vector<2xf32> to vector<2x1xf32>
    %24 = vector.broadcast %23 : vector<2x1xf32> to vector<2x128xf32>
    %25 = arith.subf %21, %24 : vector<2x128xf32>
    %26 = math.exp %25 : vector<2x128xf32>
    %cst_18 = arith.constant dense<0.000000e+00> : vector<2xf32>
    %27 = vector.multi_reduction <add>, %26, %cst_18 [1] : vector<2x128xf32> to vector<2xf32>
    %28 = vector.shape_cast %27 : vector<2xf32> to vector<2x1xf32>
    %29 = tpu.reciprocal %28 : vector<2x1xf32> -> vector<2x1xf32>
    %30 = vector.broadcast %29 : vector<2x1xf32> to vector<2x128xf32>
    %31 = arith.mulf %26, %30 : vector<2x128xf32>
    %32 = arith.truncf %31 : vector<2x128xf32> to vector<2x128xbf16>
    %c0_19 = arith.constant 0 : index
    %c0_20 = arith.constant 0 : index
    %33 = vector.load %arg8[%c0_19, %c0_20] : memref<2x128xbf16, #tpu.memory_space<vmem>>, vector<2x128xbf16>
    tpu.vector_store %arg8[%c0_19, %c0_20], %32 {strides = array<i32>} : memref<2x128xbf16, #tpu.memory_space<vmem>>, vector<2x128xbf16>,
    return
  }
  func.func @transform_0(%arg0: i32) -> (i32, i32) {
    %c0_i32 = arith.constant 0 : i32
    %c0_i32_0 = arith.constant 0 : i32
    return %arg0, %c0_i32 : i32, i32
  }
  func.func @transform_1(%arg0: i32) -> (i32, i32) {
    %c0_i32 = arith.constant 0 : i32
    %c0_i32_0 = arith.constant 0 : i32
    %c0_i32_1 = arith.constant 0 : i32
    return %c0_i32, %c0_i32_0 : i32, i32
  }
  func.func @transform_2(%arg0: i32) -> (i32, i32) {
    %c0_i32 = arith.constant 0 : i32
    %c0_i32_0 = arith.constant 0 : i32
    %c0_i32_1 = arith.constant 0 : i32
    return %c0_i32, %c0_i32_0 : i32, i32
  }
  func.func @transform_3(%arg0: i32) -> (i32, i32) {
    %c0_i32 = arith.constant 0 : i32
    %c0_i32_0 = arith.constant 0 : i32
    %c0_i32_1 = arith.constant 0 : i32
    return %c0_i32, %c0_i32_0 : i32, i32
  }
  func.func @transform_4(%arg0: i32) -> (i32, i32) {
    %c0_i32 = arith.constant 0 : i32
    %c0_i32_0 = arith.constant 0 : i32
    %c0_i32_1 = arith.constant 0 : i32
    return %c0_i32, %c0_i32_0 : i32, i32
  }
  func.func @transform_5(%arg0: i32) -> (i32, i32) {
    %c0_i32 = arith.constant 0 : i32
    %c0_i32_0 = arith.constant 0 : i32
    %c0_i32_1 = arith.constant 0 : i32
    return %c0_i32, %c0_i32_0 : i32, i32
  }
  func.func @transform_6(%arg0: i32) -> (i32, i32) {
    %c0_i32 = arith.constant 0 : i32
    %c0_i32_0 = arith.constant 0 : i32
    %c0_i32_1 = arith.constant 0 : i32
    return %c0_i32, %c0_i32_0 : i32, i32
  }
  func.func @transform_7(%arg0: i32) -> (i32, i32) {
    %c0_i32 = arith.constant 0 : i32
    %c0_i32_0 = arith.constant 0 : i32
    return %arg0, %c0_i32 : i32, i32
  }
}

</mosaic_0001>

<bundles_post_ra>
// kernel: _lambda_.1
= control target key start
LH: loop header
LB: loop body
LE: loop exit
PB: predicated region body
PF: predicated region fallthrough
CT: control target
= control target key end

     0   :  { %12 = vsyncpa [#allocation3], 0  ;;  %s587_s0 = inlined_call_operand.vmem [shape: bf16[2,16], index: 0, kind: input, shape index: {}]   ;;  %s588_s1 = inlined_call_operand.hbm [shape: bf16[16,128], index: 1, kind: input, shape index: {}]   ;;  %s589_s2 = inlined_call_operand.vmem [shape: f32[1,128], index: 2, kind: input, shape index: {}]   ;;  %s590_s3 = inlined_call_operand.hbm [shape: bf16[128,128], index: 3, kind: input, shape index: {}]   ;;  %s591_s4 = inlined_call_operand.vmem [shape: f32[1,128], index: 4, kind: input, shape index: {}]   ;;  %s592_s5 = inlined_call_operand.hbm [shape: bf16[128,128], index: 5, kind: input, shape index: {}]   ;;  %s593_s6 = inlined_call_operand.vmem [shape: f32[1,128], index: 6, kind: input, shape index: {}]   ;;  %s594_s7 = inlined_call_operand.hbm [shape: bf16[2,128], index: 7, kind: output, shape index: {}]  }
   0x1   :  { %13 = vsyncpa [#allocation6], 0 }
   0x2   :  { %14 = vsyncpa [#allocation4], 0  ;;  %s36_s26 = sshll.u32 %s590_s3, 4  ;;  %s517_s27 = smov [#allocation5]   ;;  %s37_s26 = int_to_ptr.hbm [resolvable:$true] %s36_s26 }
   0x3   :  { %s38_s28 = sshll.u32 %s517_s27, 4  ;;  %s21_s8 = sshll.u32 %s588_s1, 4  ;;  %s39_s28 = int_to_ptr.vmem [resolvable:$true] %s38_s28  ;;  %s22_s8 = int_to_ptr.hbm [resolvable:$true] %s21_s8 }
   0x4   :  { %s518_s9 = smov 64   ;;  %s519_s10 = smov 4  }
   0x5   :  { %44 = dma.hbm_to_vmem [thread:$0]  %s37_s26, 1024, %s39_s28, [#allocation6], %s518_s9, %s518_s9, %s519_s10  }
   0x6   :  { %s520_s11 = smov [#allocation2]   ;;  %s51_s15 = sshll.u32 %s592_s5, 4  ;;  %s52_s15 = int_to_ptr.hbm [resolvable:$true] %s51_s15 }
   0x7   :  { %s23_s12 = sshll.u32 %s520_s11, 4  ;;  %s521_s3 = smov [#allocation7]   ;;  %s24_s12 = int_to_ptr.vmem [resolvable:$true] %s23_s12 }
   0x8   :  { %29 = dma.hbm_to_vmem [thread:$0]  %s22_s8, 128, %s24_s12, [#allocation3], %s518_s9, %s518_s9, %s519_s10  }
   0x9   :  { %s53_s16 = sshll.u32 %s521_s3, 4  ;;  %s54_s16 = int_to_ptr.vmem [resolvable:$true] %s53_s16 }
   0xa   :  { %59 = dma.hbm_to_vmem [thread:$0]  %s52_s15, 1024, %s54_s16, [#allocation6], %s518_s9, %s518_s9, %s519_s10  }
   0xb   :  { %511 = dma.done.wait [#allocation3], 128  }
   0xc   :  { %512 = vsyncadd [#allocation3], 4294967168 }
   0xd   :  { %513 = dma.done.wait [#allocation6], 2048  }
   0xe   :  { %514 = vsyncadd [#allocation6], 4294965248  ;;  %v385_v0 = vld [vmem:[#allocation2] sm:$0xff]  ;;  %vm88_vm0 = vcmask 130048   ;;  %v392_v3 = vld [vmem:[#allocation5 + $0x30] sm:$0xff]  ;;  %vm271_vm1 = vcmask 1041408  }
   0xf   :  { %v393_v1 = vld [vmem:[#allocation5 + $0x38] sm:$0xff]  ;;  %99 = vmatpush.bf16.msra.mxu0 %v385_v0  ;;  %v391_v4 = vld [vmem:[#allocation5 + $0x28] sm:$0xff]  ;;  %v390_v5 = vld [vmem:[#allocation5 + $0x20] sm:$0xff]  ;;  %s305_s23 = sshll.u32 %s594_s7, 4  ;;  %s306_s23 = int_to_ptr.hbm [resolvable:$true] %s305_s23 }
  0x10   :  { %v75_v2 = vld [vmem:[%s587_s0] sm:$0x1]  ;;  %175 = vmatpush.bf16.msra.mxu1 %v393_v1  ;;  %v388_v7 = vld [vmem:[#allocation5 + $0x10] sm:$0xff]  ;;  %v387_v8 = vld [vmem:[#allocation5 + $0x8] sm:$0xff] }
  0x11   :  { %v389_v6 = vld [vmem:[#allocation5 + $0x18] sm:$0xff]  ;;  %v386_v9 = vld [vmem:[#allocation5] sm:$0xff]  ;;  %v400_v11 = vld [vmem:[#allocation7 + $0x30] sm:$0xff] }
  0x12   :  { %320 = vmatmul.msk.bf16.vlgmr.msra.gmra.mxu0 %vm88_vm0, %v75_v2  ;;  %v401_v10 = vld [vmem:[#allocation7 + $0x38] sm:$0xff]  ;;  %v399_v12 = vld [vmem:[#allocation7 + $0x28] sm:$0xff]  ;;  %v398_v13 = vld [vmem:[#allocation7 + $0x20] sm:$0xff] }
  0x13   :  { %258 = vmatpush.bf16.msra.mxu2 %v401_v10  ;;  %v397_v14 = vld [vmem:[#allocation7 + $0x18] sm:$0xff]  ;;  %v396_v15 = vld [vmem:[#allocation7 + $0x10] sm:$0xff]  ;;  %v395_v22 = vld [vmem:[#allocation7 + $0x8] sm:$0xff] }
  0x14   :  { %176 = vmatpush.bf16.msra.mxu1 %v392_v3  ;;  %v408_v16 = vld [vmem:[%s589_s2] ss:$0 sm:$0xff]  ;;  %v394_v23 = vld [vmem:[#allocation7] sm:$0xff] }
  0x15   :  { %v409_v24 = vld [vmem:[%s591_s4] ss:$0 sm:$0xff]  ;;  %s522_s4 = smov [#allocation8]  }
  0x16   :  { %v410_v30 = vld [vmem:[%s593_s6] ss:$0 sm:$0xff]  ;;  %s303_s6 = sshll.u32 %s522_s4, 4  ;;  %s304_s6 = int_to_ptr.vmem [resolvable:$true] %s303_s6 }
  0x17   :  { %259 = vmatpush.bf16.msra.mxu2 %v400_v11 }
  0x18   :  { %177 = vmatpush.bf16.msra.mxu1 %v391_v4 }
  0x1b   :  { %260 = vmatpush.bf16.msra.mxu2 %v399_v12 }
  0x1c   :  { %178 = vmatpush.bf16.msra.mxu1 %v390_v5 }
  0x1f   :  { %261 = vmatpush.bf16.msra.mxu2 %v398_v13 }
  0x20   :  { %179 = vmatpush.bf16.msra.mxu1 %v389_v6 }
  0x23   :  { %262 = vmatpush.bf16.msra.mxu2 %v397_v14 }
  0x24   :  { %180 = vmatpush.bf16.msra.mxu1 %v388_v7 }
  0x27   :  { %263 = vmatpush.bf16.msra.mxu2 %v396_v15 }
  0x28   :  { %181 = vmatpush.bf16.msra.mxu1 %v387_v8 }
  0x2b   :  { %264 = vmatpush.bf16.msra.mxu2 %v395_v22 }
  0x2c   :  { %182 = vmatpush.bf16.msra.mxu1 %v386_v9 }
  0x2f   :  { %265 = vmatpush.bf16.msra.mxu2 %v394_v23 }
  0x8f   :  { %v101_v17 = vpop.f32.mrf.mxu0 }
  0x90   :  { %v102_v18 = vadd.f32 %v408_v16, %v101_v17 }
  0x92   :  { %v105_v19 = vmax.f32 %v102_v18, 0.0 }
  0x94   :  { %v106_v20 = vpack.c.bf16 %v105_v19, %v105_v19 }
  0x96   :  { %183 = vmatmul.bf16.vlgmr.msra.gmra.mxu1 %v106_v20 }
  0x97   :  { %v103_v21 = vpop.f32.mrf.mxu0 }
 0x113   :  { %v184_v25 = vpop.f32.mrf.mxu1 }
 0x114   :  { %v185_v26 = vadd.f32 %v409_v24, %v184_v25 }
 0x116   :  { %v188_v27 = vmax.f32 %v185_v26, 0.0 }
 0x118   :  { %v189_v28 = vpack.c.bf16 %v188_v27, %v188_v27 }
 0x11a   :  { %266 = vmatmul.bf16.vlgmr.msra.gmra.mxu2 %v189_v28 }
 0x11b   :  { %v186_v29 = vpop.f32.mrf.mxu1 }
 0x19d   :  { %v267_v31 = vpop.f32.mrf.mxu2 }
 0x19e   :  { %v268_v32 = vadd.f32 %v410_v30, %v267_v31 }
 0x1a0   :  { %v272_v33 = vsel %vm271_vm1, %v268_v32, -inf }
 0x1a1   :  { %273 = vmax.xlane.f32.xlu0 %v272_v33 }
 0x1a5   :  { %v269_v34 = vpop.f32.mrf.mxu2 }
 0x214   :  { %v274_v35 = vpop.xlane.xlu0 %273 }
 0x215   :  { %v275_v36 = vsub.f32 %v268_v32, %v274_v35 }
 0x217   :  { %v276_v37 = vmul.f32 1.442695, %v275_v36 }
 0x219   :  { %411 = vpow2.f32 %v276_v37 }
 0x21f   :  { %v412_v38 = vpop.eup %411 }
 0x220   :  { %v278_v39 = vsel %vm271_vm1, %v412_v38, 0.0 }
 0x221   :  { %279 = vadd.xlane.f32.xlu0 %v278_v39 }
 0x294   :  { %v280_v40 = vpop.xlane.xlu0 %279 }
 0x295   :  { %413 = vrcp.f32 %v280_v40  ;;  %v292_v44 = vand.u32 2147483648, %v280_v40  ;;  %v290_v46 = vand.u32 2147483647, %v280_v40  ;;  %vm286_vm3 = vweird.f32 %v280_v40 }
 0x297   :  { %v293_v48 = vor.u32 1.1754944e-38, %v292_v44  ;;  %vm291_vm5 = vcmp.eq.f32.partialorder %v290_v46, 8.507059e+37 }
 0x29b   :  { %v414_v41 = vpop.eup %413 }
 0x29c   :  { %v282_v42 = vmul.f32 %v414_v41, %v280_v40  ;;  %vm287_vm2 = vweird.f32 %v414_v41 }
 0x29d   :  { %vm288_vm4 = vmor %vm286_vm3, %vm287_vm2 }
 0x29e   :  { %v283_v43 = vsub.f32 1.0, %v282_v42 }
 0x2a0   :  { %v284_v45 = vmul.f32 %v414_v41, %v283_v43 }
 0x2a2   :  { %v285_v47 = vadd.f32 %v414_v41, %v284_v45 }
 0x2a4   :  { %v289_v49 = vsel %vm288_vm4, %v414_v41, %v285_v47 }
 0x2a5   :  { %v294_v50 = vsel %vm291_vm5, %v293_v48, %v289_v49 }
 0x2a6   :  { %v295_v51 = vmul.f32 %v412_v38, %v294_v50 }
 0x2a8   :  { %v296_v52 = vpack.c.bf16 %v295_v51, %v295_v51 }
 0x2aa   :  { %297 = vst [vmem:[#allocation8] sm:$0x1] %v296_v52 }
 0x2ab   :  { %308 = dma.vmem_to_hbm [thread:$0]  %s304_s6, 16, %s306_s23, [#allocation4]  }
 0x2ac   :  { %515 = dma.done.wait [#allocation4], 16  }
 0x2ad   :  { %516 = vsyncadd [#allocation4], 4294967280 }
 0x2ae   :  { %313 = vsyncpa [#allocation3], 1 }
 0x2af   :  { %314 = vsyncpa [#allocation6], 1 }
 0x2b0   :  { %315 = vsyncpa [#allocation4], 1 }

</bundles_post_ra>
